<compile_context>
chip_gen: v6e
topology: v6e:2x2x1
jax: 0.10.0
libtpu: 0.0.40
codegen_flags: <defaults>
</compile_context>

<pallas_src>
import functools

import jax
import jax.numpy as jnp
from jax import lax
from jax.experimental import pallas as pl
from jax.experimental.pallas import tpu as pltpu

# Cityscapes class weights from the PyTorch module (use_weight=True) -> C = 19.
CLASS_WEIGHTS = jnp.array(
    [0.8373, 0.918, 0.866, 1.0345, 1.0166, 0.9969, 0.9754, 1.0489, 0.8786,
     1.0023, 0.9539, 0.9843, 1.1116, 0.9037, 1.0865, 1.0955, 1.0865, 1.1529,
     1.0507], dtype=jnp.float32)


def _round_up(x, m):
    return ((x + m - 1) // m) * m


# --------------------------------------------------------------------------- #
# Pass 1: fused per-pixel softmax statistics + per-batch counters
#   channels on sublanes, pixels on lanes
# --------------------------------------------------------------------------- #
def _softmax_stats_kernel(tgt_ref, logit_ref, w_ref,
                          stats_ref, nvalid_ref, nle_ref,
                          *, ignore_index, hw, tile, thresh):
    i = pl.program_id(1)

    @pl.when(i == 0)
    def _():
        nvalid_ref[...] = jnp.zeros_like(nvalid_ref)
        nle_ref[...] = jnp.zeros_like(nle_ref)

    logits = logit_ref[0].astype(jnp.float32)                    # (C, TP)
    tgt = tgt_ref[0]                                             # (1, TP) int32

    # Ragged tail: the last block may read past HW; those lanes hold garbage,
    # so fold the lane-range check into `valid` (all ops below are lane-local).
    lane = lax.broadcasted_iota(jnp.int32, tgt.shape, 1)         # (1, TP)
    in_range = (i * tile + lane) < hw
    valid = jnp.logical_and(tgt != ignore_index, in_range)       # (1, TP)
    tsafe = jnp.where(valid, tgt, 0)

    # One class-index compare drives every "gather" (no float one-hot / MXU).
    cls = lax.broadcasted_iota(jnp.int32, logits.shape, 0)       # (C, TP)
    sel = cls == tsafe                                           # (C, TP)

    m = jnp.max(logits, axis=0, keepdims=True)                   # (1, TP)
    ex = jnp.exp(logits - m)                                     # (C, TP)
    sumex = jnp.sum(ex, axis=0, keepdims=True)                   # (1, TP)
    ex_t = jnp.sum(jnp.where(sel, ex, 0.0), axis=0, keepdims=True)
    w_t = jnp.sum(jnp.where(sel, w_ref[...], 0.0), axis=0, keepdims=True)

    # mask_prob = softmax prob of the target class (1.0 where invalid, matching
    # the PyTorch masked_fill_); single divide, no extra exp / log in pass 1.
    mask_prob = jnp.where(valid, ex_t / sumex, jnp.float32(1.0))  # (1, TP)
    wt = jnp.where(valid, w_t, jnp.float32(0.0))                  # (1, TP)

    stats_ref[0] = jnp.concatenate([mask_prob, wt], axis=0)      # (2, TP)

    # Per-batch counters (accumulated across the tile axis): number of valid
    # pixels and number of valid pixels with prob <= thresh (top_k skip test).
    validf = valid.astype(jnp.float32)
    le = jnp.logical_and(valid, mask_prob <= jnp.float32(thresh))
    nvalid_ref[...] += jnp.sum(validf)
    nle_ref[...] += jnp.sum(le.astype(jnp.float32))


# --------------------------------------------------------------------------- #
# Pass 2: threshold-masked weighted reduction (per-batch scalar accumulators)
# --------------------------------------------------------------------------- #
def _ohem_reduce_kernel(thr_ref, stats_ref, num_ref, den_ref):
    @pl.when(pl.program_id(1) == 0)
    def _():
        num_ref[...] = jnp.zeros_like(num_ref)
        den_ref[...] = jnp.zeros_like(den_ref)

    thr = thr_ref[0]                                             # SMEM scalar
    mp = stats_ref[0, 0]                                         # (RB, 128)
    wt = stats_ref[0, 1]                                         # (RB, 128)
    keep_w = jnp.where(mp <= thr, wt, jnp.float32(0.0))
    # nll recomputed from mask_prob (wnll not stored by pass 1).
    # TODO(synk): the clamp caps nll at ~87.5 if mask_prob underflowed to 0
    # (logit gaps > ~88); negligible for realistic logits.
    nll = -jnp.log(jnp.maximum(mp, jnp.float32(1e-38)))
    num_ref[...] += jnp.sum(keep_w * nll)
    den_ref[...] += jnp.sum(keep_w)


# --------------------------------------------------------------------------- #
# Forward (OhemCrossEntropy2d.forward)
# --------------------------------------------------------------------------- #
def ohem_cross_entropy_2d(pred, target, *, ignore_index=-1, thresh=0.7,
                          min_kept=100000, weight=CLASS_WEIGHTS,
                          tile_pixels=65536):
    """pred: (N, C, H, W), target: (N, H, W).  Returns the scalar OHEM CE loss."""
    n, c, h, w = pred.shape
    hw = h * w
    p = n * hw

    # Lane-dense pixel tiling.  tile is a multiple of 1024 (= 8*128) so pass-2
    # blocks are (RB, 128) with RB % 8 == 0; when HW fits a single tile we use
    # one 128-aligned tile (block == full array rows, also legal).
    tile = max(1024, (int(tile_pixels) // 1024) * 1024)
    hw_ceil = _round_up(hw, 128)
    if hw_ceil <= tile:
        tile = hw_ceil
    n_tiles = -(-hw // tile)
    hw_pad = n_tiles * tile

    logits = pred.reshape(n, c, hw)                     # dtype preserved (bf16 ok)
    tgt = target.reshape(n, 1, hw).astype(jnp.int32)

    if weight is None:
        weight = jnp.ones((c,), jnp.float32)
    w_col = jnp.asarray(weight, jnp.float32).reshape(c, 1)

    # ---- pass 1: fused softmax / weight gather + counters (single logits read)
    kernel1 = functools.partial(_softmax_stats_kernel, ignore_index=ignore_index,
                                hw=hw, tile=tile, thresh=float(thresh))
    cnt_spec = pl.BlockSpec((1, 1, 128), lambda b, i: (b, 0, 0))
    stats, nvalid, nle = pl.pallas_call(
        kernel1,
        out_shape=(jax.ShapeDtypeStruct((n, 2, hw_pad), jnp.float32),
                   jax.ShapeDtypeStruct((n, 1, 128), jnp.float32),
                   jax.ShapeDtypeStruct((n, 1, 128), jnp.float32)),
        grid=(n, n_tiles),
        in_specs=[pl.BlockSpec((1, 1, tile), lambda b, i: (b, 0, i)),   # target
                  pl.BlockSpec((1, c, tile), lambda b, i: (b, 0, i)),   # logits
                  pl.BlockSpec((c, 1), lambda b, i: (0, 0))],           # weights
        out_specs=(pl.BlockSpec((1, 2, tile), lambda b, i: (b, 0, i)),  # packed stats
                   cnt_spec, cnt_spec),
        compiler_params=pltpu.CompilerParams(
            dimension_semantics=("parallel", "arbitrary"),
            vmem_limit_bytes=32 * 1024 * 1024),
    )(tgt, logits, w_col)

    num_valid = jnp.sum(nvalid[:, 0, 0].astype(jnp.int32))
    count_le = jnp.sum(nle[:, 0, 0].astype(jnp.int32))

    # PyTorch runs the filtering only when NOT (min_kept > num_valid) and
    # num_valid > 0, i.e. num_valid >= min_kept (and > 0).
    apply_ohem = jnp.logical_and(num_valid >= min_kept, num_valid > 0)

    threshold = jnp.float32(thresh)
    if min_kept > 0:
        k = min(p, int(min_kept))
        # If >= k probs are already <= thresh, the k-th smallest is <= thresh and
        # PyTorch keeps threshold == thresh -> skip the expensive top_k entirely.
        need_topk = jnp.logical_and(apply_ohem, count_le < k)

        def _kth_smallest(st):
            mp_flat = st[:, 0, :].reshape(-1)
            # Invalid / padded pixels carry prob 1.0 (the maximum), so they never
            # displace the k-th smallest for k <= N*H*W (matches the PyTorch sort).
            kth = -lax.top_k(-mp_flat, k)[0][k - 1]
            return jnp.maximum(kth, jnp.asarray(thresh, jnp.float32))

        threshold = lax.cond(need_topk, _kth_smallest,
                             lambda st: jnp.asarray(thresh, jnp.float32), stats)

    # 2.0 > any probability -> keeps every valid pixel when OHEM is bypassed.
    # TODO(synk): the module's `print('Lables: ...')` debug message is dropped;
    # it would force a device->host sync under jit.
    eff_threshold = jnp.where(apply_ohem, threshold, jnp.float32(2.0)).reshape(1)

    # ---- pass 2: threshold-masked weighted reduction (8 B/px, full vreg occupancy)
    rows = hw_pad // 128
    rb = tile // 128
    stats4 = stats.reshape(n, 2, rows, 128)             # contiguous -> free
    num_o, den_o = pl.pallas_call(
        _ohem_reduce_kernel,
        out_shape=(jax.ShapeDtypeStruct((n, 1, 128), jnp.float32),
                   jax.ShapeDtypeStruct((n, 1, 128), jnp.float32)),
        grid=(n, n_tiles),
        in_specs=[pl.BlockSpec(memory_space=pltpu.MemorySpace.SMEM),    # threshold
                  pl.BlockSpec((1, 2, rb, 128), lambda b, i: (b, 0, i, 0))],
        out_specs=(pl.BlockSpec((1, 1, 128), lambda b, i: (b, 0, 0)),
                   pl.BlockSpec((1, 1, 128), lambda b, i: (b, 0, 0))),
        compiler_params=pltpu.CompilerParams(
            dimension_semantics=("parallel", "arbitrary"),
            vmem_limit_bytes=32 * 1024 * 1024),
    )(eff_threshold, stats4)

    # CrossEntropyLoss(weight, reduction='mean'): sum(w*nll) / sum(w) over kept px.
    return jnp.sum(num_o[:, 0, 0]) / jnp.sum(den_o[:, 0, 0])


def mix_softmax_cross_entropy_ohem_loss(preds, target, *, aux=False, aux_weight=0.4,
                                        ignore_index=-1, thresh=0.7, min_kept=100000,
                                        weight=CLASS_WEIGHTS, tile_pixels=65536):
    """MixSoftmaxCrossEntropyOHEMLoss.forward: dict(loss = OHEM CE (+ aux heads))."""
    if not isinstance(preds, (list, tuple)):
        preds = (preds,)
    kw = dict(ignore_index=ignore_index, thresh=thresh, min_kept=min_kept,
              weight=weight, tile_pixels=tile_pixels)
    loss = ohem_cross_entropy_2d(preds[0], target, **kw)
    if aux:
        for aux_pred in preds[1:]:
            loss = loss + aux_weight * ohem_cross_entropy_2d(aux_pred, target, **kw)
    return dict(loss=loss)


# --------------------------------------------------------------------------- #
# Pure-JAX reference mirroring the PyTorch forward
# --------------------------------------------------------------------------- #
def ohem_cross_entropy_2d_ref(pred, target, *, ignore_index=-1, thresh=0.7,
                              min_kept=100000, weight=CLASS_WEIGHTS):
    n, c, h, w = pred.shape
    p = n * h * w
    logits = jnp.transpose(pred, (0, 2, 3, 1)).reshape(p, c).astype(jnp.float32)
    tgt = target.reshape(p).astype(jnp.int32)
    valid = tgt != ignore_index
    tsafe = jnp.where(valid, tgt, 0)
    num_valid = jnp.sum(valid)

    prob = jax.nn.softmax(logits, axis=-1)
    mask_prob = jnp.where(valid, prob[jnp.arange(p), tsafe], 1.0)

    threshold = jnp.float32(thresh)
    if min_kept > 0:
        sp = jnp.sort(mask_prob)
        tv = sp[min(p, min_kept) - 1]
        threshold = jnp.where(tv > thresh, tv, threshold)
    apply = jnp.logical_and(num_valid >= min_kept, num_valid > 0)
    kept = jnp.where(apply, mask_prob <= threshold, True)
    keep = (valid & kept).astype(jnp.float32)

    lse = jax.scipy.special.logsumexp(logits, axis=-1)
    nll = lse - logits[jnp.arange(p), tsafe]
    if weight is None:
        weight = jnp.ones((c,), jnp.float32)
    wt = jnp.asarray(weight, jnp.float32)[tsafe]
    return jnp.sum(keep * wt * nll) / jnp.sum(keep * wt)


if __name__ == "__main__":
    key = jax.random.PRNGKey(0)
    k1, k2, k3, k4 = jax.random.split(key, 4)

    N, C, H, W = 2, 19, 16, 16          # C = 19 to match the module's class weights
    pred = jax.random.normal(k1, (N, C, H, W), jnp.float32) * 3.0
    target = jax.random.randint(k2, (N, H, W), -1, C).astype(jnp.int32)

    def check(pr, tg, **kw):
        got = jax.block_until_ready(
            jax.jit(functools.partial(ohem_cross_entropy_2d, **kw))(pr, tg))
        ref = ohem_cross_entropy_2d_ref(pr, tg, **kw)
        assert bool(jnp.isfinite(got)), f"non-finite loss: {got}"
        assert bool(jnp.allclose(got, ref, rtol=1e-3, atol=1e-4)), (got, ref, kw)
        return got

    # OHEM filter active, common fast path (count(prob <= thresh) >= min_kept -> no top_k).
    loss = check(pred, target, ignore_index=-1, thresh=0.7, min_kept=128)
    # Rare path: thresh so small that the lax.top_k fallback must run.
    check(pred, target, ignore_index=-1, thresh=1e-9, min_kept=128)
    # Bypass path: min_kept > num_valid -> plain weighted CE over all valid pixels.
    check(pred, target, ignore_index=-1, thresh=0.7, min_kept=100000)
    # Ragged spatial size (HW not a multiple of 128): exercises in-kernel tail masking.
    pred2 = jax.random.normal(k3, (N, C, 15, 15), jnp.float32) * 3.0
    target2 = jax.random.randint(k4, (N, 15, 15), -1, C).astype(jnp.int32)
    check(pred2, target2, ignore_index=-1, thresh=0.7, min_kept=64)

    # MixSoftmaxCrossEntropyOHEMLoss-style call (aux heads, returns dict(loss=...)).
    out = mix_softmax_cross_entropy_ohem_loss((pred, pred), target, aux=True,
                                              aux_weight=0.4, ignore_index=-1,
                                              thresh=0.7, min_kept=128)
    aux_loss = jax.block_until_ready(out["loss"])
    assert bool(jnp.allclose(aux_loss, loss * 1.4, rtol=1e-3, atol=1e-4)), (aux_loss, loss)

    print("KERNEL_OK")
</pallas_src>

<mosaic_0001>
module attributes {stable_mosaic.version = 11 : i64} {
  func.func @_softmax_stats_kernel(%arg0: i32, %arg1: i32, %arg2: memref<1x1x256xi32, #tpu.memory_space<vmem>>, %arg3: memref<1x19x256xf32, #tpu.memory_space<vmem>>, %arg4: memref<19x1xf32, #tpu.memory_space<vmem>>, %arg5: memref<1x2x256xf32, #tpu.memory_space<vmem>>, %arg6: memref<1x1x128xf32, #tpu.memory_space<vmem>>, %arg7: memref<1x1x128xf32, #tpu.memory_space<vmem>>) attributes {dimension_semantics = [#tpu.dimension_semantics<parallel>, #tpu.dimension_semantics<arbitrary>], iteration_bounds = array<i64: 2, 1>, scalar_prefetch = 0 : i64, scratch_operands = 0 : i64, tpu.core_type = #tpu.core_type<tc>, window_params = [{transform_indices = @transform_0, window_bounds = array<i64: 1, 1, 256>}, {transform_indices = @transform_1, window_bounds = array<i64: 1, 19, 256>}, {pipeline_mode = #tpu.pipeline_mode<synchronous>, transform_indices = @transform_2, window_bounds = array<i64: 19, 1>}, {transform_indices = @transform_3, window_bounds = array<i64: 1, 2, 256>}, {transform_indices = @transform_4, window_bounds = array<i64: 1, 1, 128>}, {transform_indices = @transform_5, window_bounds = array<i64: 1, 1, 128>}]} {
    %c0_i32 = arith.constant 0 : i32
    %0 = arith.cmpi eq, %arg1, %c0_i32 : i32
    %1 = arith.extui %0 : i1 to i32
    %c0_i32_0 = arith.constant 0 : i32
    %2 = arith.cmpi ne, %1, %c0_i32_0 : i32
    scf.if %2 {
      %cst_35 = arith.constant 0.000000e+00 : f32
      %71 = vector.broadcast %cst_35 : f32 to vector<1x1x128xf32>
      %c0_36 = arith.constant 0 : index
      %c0_37 = arith.constant 0 : index
      %c0_38 = arith.constant 0 : index
      %72 = vector.load %arg6[%c0_36, %c0_37, %c0_38] : memref<1x1x128xf32, #tpu.memory_space<vmem>>, vector<1x1x128xf32>
      tpu.vector_store %arg6[%c0_36, %c0_37, %c0_38], %71 {strides = array<i32>} : memref<1x1x128xf32, #tpu.memory_space<vmem>>, vector<1x1x128xf32>,
      %cst_39 = arith.constant 0.000000e+00 : f32
      %73 = vector.broadcast %cst_39 : f32 to vector<1x1x128xf32>
      %c0_40 = arith.constant 0 : index
      %c0_41 = arith.constant 0 : index
      %c0_42 = arith.constant 0 : index
      %74 = vector.load %arg7[%c0_40, %c0_41, %c0_42] : memref<1x1x128xf32, #tpu.memory_space<vmem>>, vector<1x1x128xf32>
      tpu.vector_store %arg7[%c0_40, %c0_41, %c0_42], %73 {strides = array<i32>} : memref<1x1x128xf32, #tpu.memory_space<vmem>>, vector<1x1x128xf32>,
    } else {
    }
    %c0 = arith.constant 0 : index
    %c0_1 = arith.constant 0 : index
    %c0_2 = arith.constant 0 : index
    %3 = vector.load %arg3[%c0, %c0_1, %c0_2] : memref<1x19x256xf32, #tpu.memory_space<vmem>>, vector<1x19x256xf32>
    %4 = vector.shape_cast %3 : vector<1x19x256xf32> to vector<19x256xf32>
    %c0_3 = arith.constant 0 : index
    %c0_4 = arith.constant 0 : index
    %c0_5 = arith.constant 0 : index
    %5 = vector.load %arg2[%c0_3, %c0_4, %c0_5] : memref<1x1x256xi32, #tpu.memory_space<vmem>>, vector<1x1x256xi32>
    %6 = vector.shape_cast %5 : vector<1x1x256xi32> to vector<1x256xi32>
    %7 = tpu.iota {dimensions = array<i32: 1>} : vector<1x256xi32>
    %c256_i32 = arith.constant 256 : i32
    %8 = arith.muli %arg1, %c256_i32 : i32
    %9 = vector.broadcast %8 : i32 to vector<1x256xi32>
    %10 = arith.addi %9, %7 : vector<1x256xi32>
    %c256_i32_6 = arith.constant 256 : i32
    %11 = vector.broadcast %c256_i32_6 : i32 to vector<1x256xi32>
    %12 = arith.cmpi slt, %10, %11 : vector<1x256xi32>
    %c-1_i32 = arith.constant -1 : i32
    %13 = vector.broadcast %c-1_i32 : i32 to vector<1x256xi32>
    %14 = arith.cmpi ne, %6, %13 : vector<1x256xi32>
    %15 = arith.andi %14, %12 : vector<1x256xi1>
    %c0_i32_7 = arith.constant 0 : i32
    %16 = vector.broadcast %c0_i32_7 : i32 to vector<1x256xi32>
    %17 = arith.select %15, %6, %16 : vector<1x256xi1>, vector<1x256xi32>
    %18 = tpu.iota {dimensions = array<i32: 0>} : vector<19x256xi32>
    %19 = vector.broadcast %17 : vector<1x256xi32> to vector<19x256xi32>
    %20 = arith.cmpi eq, %18, %19 : vector<19x256xi32>
    %cst = arith.constant dense<0xFF800000> : vector<256xf32>
    %21 = vector.multi_reduction <maximumf>, %4, %cst [0] : vector<19x256xf32> to vector<256xf32>
    %22 = vector.shape_cast %21 : vector<256xf32> to vector<1x256xf32>
    %23 = vector.broadcast %22 : vector<1x256xf32> to vector<19x256xf32>
    %24 = arith.subf %4, %23 : vector<19x256xf32>
    %25 = math.exp %24 : vector<19x256xf32>
    %cst_8 = arith.constant dense<0.000000e+00> : vector<256xf32>
    %26 = vector.multi_reduction <add>, %25, %cst_8 [0] : vector<19x256xf32> to vector<256xf32>
    %27 = vector.shape_cast %26 : vector<256xf32> to vector<1x256xf32>
    %cst_9 = arith.constant 0.000000e+00 : f32
    %28 = vector.broadcast %cst_9 : f32 to vector<19x256xf32>
    %29 = arith.select %20, %25, %28 : vector<19x256xi1>, vector<19x256xf32>
    %cst_10 = arith.constant dense<0.000000e+00> : vector<256xf32>
    %30 = vector.multi_reduction <add>, %29, %cst_10 [0] : vector<19x256xf32> to vector<256xf32>
    %31 = vector.shape_cast %30 : vector<256xf32> to vector<1x256xf32>
    %c0_11 = arith.constant 0 : index
    %c0_12 = arith.constant 0 : index
    %32 = vector.load %arg4[%c0_11, %c0_12] : memref<19x1xf32, #tpu.memory_space<vmem>>, vector<19x1xf32>
    %cst_13 = arith.constant 0.000000e+00 : f32
    %33 = vector.shape_cast %32 : vector<19x1xf32> to vector<19x1xf32>
    %34 = vector.broadcast %33 : vector<19x1xf32> to vector<19x256xf32>
    %35 = vector.broadcast %cst_13 : f32 to vector<19x256xf32>
    %36 = arith.select %20, %34, %35 : vector<19x256xi1>, vector<19x256xf32>
    %cst_14 = arith.constant dense<0.000000e+00> : vector<256xf32>
    %37 = vector.multi_reduction <add>, %36, %cst_14 [0] : vector<19x256xf32> to vector<256xf32>
    %38 = vector.shape_cast %37 : vector<256xf32> to vector<1x256xf32>
    %39 = arith.divf %31, %27 : vector<1x256xf32>
    %cst_15 = arith.constant 1.000000e+00 : f32
    %40 = vector.broadcast %cst_15 : f32 to vector<1x256xf32>
    %41 = arith.select %15, %39, %40 : vector<1x256xi1>, vector<1x256xf32>
    %cst_16 = arith.constant 0.000000e+00 : f32
    %42 = vector.broadcast %cst_16 : f32 to vector<1x256xf32>
    %43 = arith.select %15, %38, %42 : vector<1x256xi1>, vector<1x256xf32>
    %44 = tpu.concatenate %41, %43 in 0 : vector<1x256xf32>, vector<1x256xf32> -> vector<2x256xf32>
    %c0_17 = arith.constant 0 : index
    %c0_18 = arith.constant 0 : index
    %c0_19 = arith.constant 0 : index
    %45 = vector.load %arg5[%c0_17, %c0_18, %c0_19] : memref<1x2x256xf32, #tpu.memory_space<vmem>>, vector<1x2x256xf32>
    %46 = vector.shape_cast %45 : vector<1x2x256xf32> to vector<2x256xf32>
    %47 = vector.shape_cast %44 : vector<2x256xf32> to vector<1x2x256xf32>
    tpu.vector_store %arg5[%c0_17, %c0_18, %c0_19], %47 {strides = array<i32>} : memref<1x2x256xf32, #tpu.memory_space<vmem>>, vector<1x2x256xf32>,
    %48 = arith.extui %15 : vector<1x256xi1> to vector<1x256xi32>
    %49 = arith.sitofp %48 : vector<1x256xi32> to vector<1x256xf32>
    %cst_20 = arith.constant 0.699999988 : f32
    %50 = vector.broadcast %cst_20 : f32 to vector<1x256xf32>
    %51 = arith.cmpf ole, %41, %50 : vector<1x256xf32>
    %52 = arith.andi %15, %51 : vector<1x256xi1>
    %c0_21 = arith.constant 0 : index
    %c0_22 = arith.constant 0 : index
    %c0_23 = arith.constant 0 : index
    %53 = vector.load %arg6[%c0_21, %c0_22, %c0_23] : memref<1x1x128xf32, #tpu.memory_space<vmem>>, vector<1x1x128xf32>
    %54 = vector.shape_cast %49 : vector<1x256xf32> to vector<1x1x256xf32>
    %cst_24 = arith.constant dense<0.000000e+00> : vector<1xf32>
    %55 = vector.multi_reduction <add>, %54, %cst_24 [1, 2] : vector<1x1x256xf32> to vector<1xf32>
    %56 = vector.shape_cast %55 : vector<1xf32> to vector<1x1x1xf32>
    %57 = vector.extract %56[0, 0, 0] : f32 from vector<1x1x1xf32>
    %58 = vector.broadcast %57 : f32 to vector<1x1x128xf32>
    %59 = arith.addf %53, %58 : vector<1x1x128xf32>
    %c0_25 = arith.constant 0 : index
    %c0_26 = arith.constant 0 : index
    %c0_27 = arith.constant 0 : index
    %60 = vector.load %arg6[%c0_25, %c0_26, %c0_27] : memref<1x1x128xf32, #tpu.memory_space<vmem>>, vector<1x1x128xf32>
    tpu.vector_store %arg6[%c0_25, %c0_26, %c0_27], %59 {strides = array<i32>} : memref<1x1x128xf32, #tpu.memory_space<vmem>>, vector<1x1x128xf32>,
    %c0_28 = arith.constant 0 : index
    %c0_29 = arith.constant 0 : index
    %c0_30 = arith.constant 0 : index
    %61 = vector.load %arg7[%c0_28, %c0_29, %c0_30] : memref<1x1x128xf32, #tpu.memory_space<vmem>>, vector<1x1x128xf32>
    %62 = arith.extui %52 : vector<1x256xi1> to vector<1x256xi32>
    %63 = arith.sitofp %62 : vector<1x256xi32> to vector<1x256xf32>
    %64 = vector.shape_cast %63 : vector<1x256xf32> to vector<1x1x256xf32>
    %cst_31 = arith.constant dense<0.000000e+00> : vector<1xf32>
    %65 = vector.multi_reduction <add>, %64, %cst_31 [1, 2] : vector<1x1x256xf32> to vector<1xf32>
    %66 = vector.shape_cast %65 : vector<1xf32> to vector<1x1x1xf32>
    %67 = vector.extract %66[0, 0, 0] : f32 from vector<1x1x1xf32>
    %68 = vector.broadcast %67 : f32 to vector<1x1x128xf32>
    %69 = arith.addf %61, %68 : vector<1x1x128xf32>
    %c0_32 = arith.constant 0 : index
    %c0_33 = arith.constant 0 : index
    %c0_34 = arith.constant 0 : index
    %70 = vector.load %arg7[%c0_32, %c0_33, %c0_34] : memref<1x1x128xf32, #tpu.memory_space<vmem>>, vector<1x1x128xf32>
    tpu.vector_store %arg7[%c0_32, %c0_33, %c0_34], %69 {strides = array<i32>} : memref<1x1x128xf32, #tpu.memory_space<vmem>>, vector<1x1x128xf32>,
    return
  }
  func.func @transform_0(%arg0: i32, %arg1: i32) -> (i32, i32, i32) {
    %c0_i32 = arith.constant 0 : i32
    %c0_i32_0 = arith.constant 0 : i32
    return %arg0, %c0_i32, %arg1 : i32, i32, i32
  }
  func.func @transform_1(%arg0: i32, %arg1: i32) -> (i32, i32, i32) {
    %c0_i32 = arith.constant 0 : i32
    %c0_i32_0 = arith.constant 0 : i32
    return %arg0, %c0_i32, %arg1 : i32, i32, i32
  }
  func.func @transform_2(%arg0: i32, %arg1: i32) -> (i32, i32) {
    %c0_i32 = arith.constant 0 : i32
    %c0_i32_0 = arith.constant 0 : i32
    %c0_i32_1 = arith.constant 0 : i32
    return %c0_i32, %c0_i32_0 : i32, i32
  }
  func.func @transform_3(%arg0: i32, %arg1: i32) -> (i32, i32, i32) {
    %c0_i32 = arith.constant 0 : i32
    %c0_i32_0 = arith.constant 0 : i32
    return %arg0, %c0_i32, %arg1 : i32, i32, i32
  }
  func.func @transform_4(%arg0: i32, %arg1: i32) -> (i32, i32, i32) {
    %c0_i32 = arith.constant 0 : i32
    %c0_i32_0 = arith.constant 0 : i32
    %c0_i32_1 = arith.constant 0 : i32
    return %arg0, %c0_i32, %c0_i32_0 : i32, i32, i32
  }
  func.func @transform_5(%arg0: i32, %arg1: i32) -> (i32, i32, i32) {
    %c0_i32 = arith.constant 0 : i32
    %c0_i32_0 = arith.constant 0 : i32
    %c0_i32_1 = arith.constant 0 : i32
    return %arg0, %c0_i32, %c0_i32_0 : i32, i32, i32
  }
}

module attributes {stable_mosaic.version = 11 : i64} {
  func.func @_ohem_reduce_kernel(%arg0: i32, %arg1: i32, %arg2: memref<1xf32, #tpu.memory_space<smem>>, %arg3: memref<1x2x2x128xf32, #tpu.memory_space<vmem>>, %arg4: memref<1x1x128xf32, #tpu.memory_space<vmem>>, %arg5: memref<1x1x128xf32, #tpu.memory_space<vmem>>) attributes {dimension_semantics = [#tpu.dimension_semantics<parallel>, #tpu.dimension_semantics<arbitrary>], iteration_bounds = array<i64: 2, 1>, scalar_prefetch = 0 : i64, scratch_operands = 0 : i64, tpu.core_type = #tpu.core_type<tc>, window_params = [{transform_indices = @transform_0, window_bounds = array<i64: 1>}, {transform_indices = @transform_1, window_bounds = array<i64: 1, 2, 2, 128>}, {transform_indices = @transform_2, window_bounds = array<i64: 1, 1, 128>}, {transform_indices = @transform_3, window_bounds = array<i64: 1, 1, 128>}]} {
    %c0_i32 = arith.constant 0 : i32
    %0 = arith.cmpi eq, %arg1, %c0_i32 : i32
    %1 = arith.extui %0 : i1 to i32
    %c0_i32_0 = arith.constant 0 : i32
    %2 = arith.cmpi ne, %1, %c0_i32_0 : i32
    scf.if %2 {
      %cst_24 = arith.constant 0.000000e+00 : f32
      %34 = vector.broadcast %cst_24 : f32 to vector<1x1x128xf32>
      %c0_25 = arith.constant 0 : index
      %c0_26 = arith.constant 0 : index
      %c0_27 = arith.constant 0 : index
      %35 = vector.load %arg4[%c0_25, %c0_26, %c0_27] : memref<1x1x128xf32, #tpu.memory_space<vmem>>, vector<1x1x128xf32>
      tpu.vector_store %arg4[%c0_25, %c0_26, %c0_27], %34 {strides = array<i32>} : memref<1x1x128xf32, #tpu.memory_space<vmem>>, vector<1x1x128xf32>,
      %cst_28 = arith.constant 0.000000e+00 : f32
      %36 = vector.broadcast %cst_28 : f32 to vector<1x1x128xf32>
      %c0_29 = arith.constant 0 : index
      %c0_30 = arith.constant 0 : index
      %c0_31 = arith.constant 0 : index
      %37 = vector.load %arg5[%c0_29, %c0_30, %c0_31] : memref<1x1x128xf32, #tpu.memory_space<vmem>>, vector<1x1x128xf32>
      tpu.vector_store %arg5[%c0_29, %c0_30, %c0_31], %36 {strides = array<i32>} : memref<1x1x128xf32, #tpu.memory_space<vmem>>, vector<1x1x128xf32>,
    } else {
    }
    %c0 = arith.constant 0 : index
    %3 = memref.load %arg2[%c0] : memref<1xf32, #tpu.memory_space<smem>>
    %c0_1 = arith.constant 0 : index
    %c0_2 = arith.constant 0 : index
    %c0_3 = arith.constant 0 : index
    %c0_4 = arith.constant 0 : index
    %4 = vector.load %arg3[%c0_1, %c0_2, %c0_3, %c0_4] : memref<1x2x2x128xf32, #tpu.memory_space<vmem>>, vector<1x1x2x128xf32>
    %5 = vector.shape_cast %4 : vector<1x1x2x128xf32> to vector<2x128xf32>
    %c0_5 = arith.constant 0 : index
    %c1 = arith.constant 1 : index
    %c0_6 = arith.constant 0 : index
    %c0_7 = arith.constant 0 : index
    %6 = vector.load %arg3[%c0_5, %c1, %c0_6, %c0_7] : memref<1x2x2x128xf32, #tpu.memory_space<vmem>>, vector<1x1x2x128xf32>
    %7 = vector.shape_cast %6 : vector<1x1x2x128xf32> to vector<2x128xf32>
    %8 = vector.broadcast %3 : f32 to vector<2x128xf32>
    %9 = arith.cmpf ole, %5, %8 : vector<2x128xf32>
    %cst = arith.constant 0.000000e+00 : f32
    %10 = vector.broadcast %cst : f32 to vector<2x128xf32>
    %11 = arith.select %9, %7, %10 : vector<2x128xi1>, vector<2x128xf32>
    %cst_8 = arith.constant 9.99999935E-39 : f32
    %12 = vector.broadcast %cst_8 : f32 to vector<2x128xf32>
    %13 = arith.maximumf %5, %12 : vector<2x128xf32>
    %14 = math.log %13 : vector<2x128xf32>
    %cst_9 = arith.constant 0.000000e+00 : f32
    %15 = vector.broadcast %cst_9 : f32 to vector<2x128xf32>
    %16 = arith.subf %15, %14 : vector<2x128xf32>
    %c0_10 = arith.constant 0 : index
    %c0_11 = arith.constant 0 : index
    %c0_12 = arith.constant 0 : index
    %17 = vector.load %arg4[%c0_10, %c0_11, %c0_12] : memref<1x1x128xf32, #tpu.memory_space<vmem>>, vector<1x1x128xf32>
    %18 = arith.mulf %11, %16 : vector<2x128xf32>
    %19 = vector.shape_cast %18 : vector<2x128xf32> to vector<1x2x128xf32>
    %cst_13 = arith.constant dense<0.000000e+00> : vector<1xf32>
    %20 = vector.multi_reduction <add>, %19, %cst_13 [1, 2] : vector<1x2x128xf32> to vector<1xf32>
    %21 = vector.shape_cast %20 : vector<1xf32> to vector<1x1x1xf32>
    %22 = vector.extract %21[0, 0, 0] : f32 from vector<1x1x1xf32>
    %23 = vector.broadcast %22 : f32 to vector<1x1x128xf32>
    %24 = arith.addf %17, %23 : vector<1x1x128xf32>
    %c0_14 = arith.constant 0 : index
    %c0_15 = arith.constant 0 : index
    %c0_16 = arith.constant 0 : index
    %25 = vector.load %arg4[%c0_14, %c0_15, %c0_16] : memref<1x1x128xf32, #tpu.memory_space<vmem>>, vector<1x1x128xf32>
    tpu.vector_store %arg4[%c0_14, %c0_15, %c0_16], %24 {strides = array<i32>} : memref<1x1x128xf32, #tpu.memory_space<vmem>>, vector<1x1x128xf32>,
    %c0_17 = arith.constant 0 : index
    %c0_18 = arith.constant 0 : index
    %c0_19 = arith.constant 0 : index
    %26 = vector.load %arg5[%c0_17, %c0_18, %c0_19] : memref<1x1x128xf32, #tpu.memory_space<vmem>>, vector<1x1x128xf32>
    %27 = vector.shape_cast %11 : vector<2x128xf32> to vector<1x2x128xf32>
    %cst_20 = arith.constant dense<0.000000e+00> : vector<1xf32>
    %28 = vector.multi_reduction <add>, %27, %cst_20 [1, 2] : vector<1x2x128xf32> to vector<1xf32>
    %29 = vector.shape_cast %28 : vector<1xf32> to vector<1x1x1xf32>
    %30 = vector.extract %29[0, 0, 0] : f32 from vector<1x1x1xf32>
    %31 = vector.broadcast %30 : f32 to vector<1x1x128xf32>
    %32 = arith.addf %26, %31 : vector<1x1x128xf32>
    %c0_21 = arith.constant 0 : index
    %c0_22 = arith.constant 0 : index
    %c0_23 = arith.constant 0 : index
    %33 = vector.load %arg5[%c0_21, %c0_22, %c0_23] : memref<1x1x128xf32, #tpu.memory_space<vmem>>, vector<1x1x128xf32>
    tpu.vector_store %arg5[%c0_21, %c0_22, %c0_23], %32 {strides = array<i32>} : memref<1x1x128xf32, #tpu.memory_space<vmem>>, vector<1x1x128xf32>,
    return
  }
  func.func @transform_0(%arg0: i32, %arg1: i32) -> i32 {
    %c0_i32 = arith.constant 0 : i32
    %c0_i32_0 = arith.constant 0 : i32
    return %c0_i32 : i32
  }
  func.func @transform_1(%arg0: i32, %arg1: i32) -> (i32, i32, i32, i32) {
    %c0_i32 = arith.constant 0 : i32
    %c0_i32_0 = arith.constant 0 : i32
    %c0_i32_1 = arith.constant 0 : i32
    return %arg0, %c0_i32, %arg1, %c0_i32_0 : i32, i32, i32, i32
  }
  func.func @transform_2(%arg0: i32, %arg1: i32) -> (i32, i32, i32) {
    %c0_i32 = arith.constant 0 : i32
    %c0_i32_0 = arith.constant 0 : i32
    %c0_i32_1 = arith.constant 0 : i32
    return %arg0, %c0_i32, %c0_i32_0 : i32, i32, i32
  }
  func.func @transform_3(%arg0: i32, %arg1: i32) -> (i32, i32, i32) {
    %c0_i32 = arith.constant 0 : i32
    %c0_i32_0 = arith.constant 0 : i32
    %c0_i32_1 = arith.constant 0 : i32
    return %arg0, %c0_i32, %c0_i32_0 : i32, i32, i32
  }
}

</mosaic_0001>

<bundles_post_ra>
// kernel: ohem_cross_entropy_2d.2
= control target key start
LH: loop header
LB: loop body
LE: loop exit
PB: predicated region body
PF: predicated region fallthrough
CT: control target
= control target key end

     0   :  { %s911_s18 = smov 0   ;;  %s913_s19 = smov 0   ;;  %s1096_s0 = inlined_call_operand.vmem [shape: s32[2,1,256], index: 0, kind: input, shape index: {}]   ;;  %s1097_s1 = inlined_call_operand.vmem [shape: f32[2,19,256], index: 1, kind: input, shape index: {}]   ;;  %s1098_s2 = inlined_call_operand.vmem [shape: f32[19,1], index: 2, kind: input, shape index: {}]   ;;  %s1099_s3 = inlined_call_operand.vmem [shape: f32[2,2,256], index: 3, kind: output, shape index: {0}]   ;;  %s1100_s4 = inlined_call_operand.vmem [shape: f32[2,1,128], index: 4, kind: output, shape index: {1}]   ;;  %s1101_s5 = inlined_call_operand.vmem [shape: f32[2,1,128], index: 5, kind: output, shape index: {2}]  }
   0x1   :  { %s915_s20 = smov 0  }
   0x2 LB: > { %s28_s21 = sadd.s32 1, %s871_s19  ;;  %p791_p0 = scmp.ge.s32.totalorder %s875_s20, 1  ;;  %s875_s20 = sphi %s915_s20, %s16_s20   ;;  %s871_s19 = sphi %s913_s19, %s1105_s19   ;;  %s867_s18 = sphi %s911_s18, %s1104_s18  }
   0x3   : > { %p30_p1 = scmp.ge.s32.totalorder %s28_s21, 2  ;;  %p229_p2 = scmp.lt.s32.totalorder %s875_s20, 3 }
   0x5   : > { %s1107_s21 = smov (%p30_p1, %s28_s21), 0  ;;  %p230_p3 = pnand %p791_p0, %p229_p2 }
   0x6   : > { %p280_p4 = scmp.lt.s32.totalorder (!%p230_p3), %s867_s18, 1 }
   0x7   : > { %233 = sbr.rel (%p230_p3) target bundleno = 308 (0x134), region = 32 }
   0xc   : > { %v343_v0 = vlaneseq  ;;  %v877_v1 = vmov 1966171168   ;;  %v454_v3 = vld [vmem:[%s1098_s2] sm:$0xff]  ;;  %s1109_s18 = smov (!%p280_p4, %s867_s18), 1  ;;  %v878_v5 = vmov 1   ;;  %v879_v8 = vmov 0  }
   0xd   : > { %v341_v2 = vunpack.c.l.s4 %v877_v1  ;;  %v339_v6 = vcombine.low %v878_v5, %v878_v5  ;;  %835 = vset.pattern.permute.xlu1 %v879_v8  ;;  %836 = vset.pattern.permute.xlu0 %v879_v8  ;;  %s792_s24 = sshll.u32 %s1109_s18, 1  ;;  %s802_s25 = smul.u32 48, %s1109_s18  ;;  %v455_v10 = vld [vmem:[%s1098_s2 + $0x8] sm:$0xff]  ;;  %vm375_vm0 = vcmask 1042432   ;;  %vm560_vm4 = vcmask 1040384  }
   0xe   : > { %v934_v4 = vshrl.u32 %v343_v0, 7  ;;  %459 = vperm.xlu1 %835, %v454_v3   ;;  %s286_s28 = scalar_lea.vmem %s1096_s0, %s792_s24  ;;  %v880_v29 = vmov 0.0   ;;  %s310_s13 = scalar_lea.vmem %s1100_s4, %s1109_s18 }
   0xf   : > { %v342_v7 = vunpack.c.0.s8 %v341_v2  ;;  %s296_s8 = scalar_lea.vmem %s1097_s1, %s802_s25  ;;  %v326_v11 = vld [vmem:[%s286_s28] sm:$0x3]  ;;  %s1044_s16 = scalar_lea.vmem %s1101_s5, %s1109_s18  ;;  %318 = vst [vmem:[%s310_s13] sm:$0x1] %v880_v29 }
  0x10   : > { %v320_v12 = vld [vmem:[%s296_s8] sm:$0xff]  ;;  %v321_v13 = vld [vmem:[%s296_s8 + $0x8] sm:$0xff]  ;;  %v322_v17 = vld [vmem:[%s296_s8 + $0x10] sm:$0xff]  ;;  %vm336_vm1 = vcmp.ne.s32.totalorder %v326_v11, 4294967295  ;;  %v959_v25 = vsub.s32 0, %v934_v4  ;;  %v962_v26 = vsub.s32 1, %v934_v4 }
  0x11   : > { %v942_v9 = vsub.s32 %v342_v7, %v934_v4  ;;  %v324_v15 = vld [vmem:[%s296_s8 + $0x20] sm:$0x7]  ;;  %v325_v16 = vld [vmem:[%s296_s8 + $0x28] sm:$0x7]  ;;  %v323_v18 = vld [vmem:[%s296_s8 + $0x18] sm:$0xff]  ;;  %v980_v63 = vadd.s32 8, %v934_v4 }
  0x12   : > { %464 = vperm.xlu1 %835, %v455_v10   ;;  %v376_v20 = vsel %vm375_vm0, %v324_v15, -inf  ;;  %v385_v21 = vsel %vm375_vm0, %v325_v16, -inf  ;;  %v983_v0 = vadd.s32 16, %v934_v4  ;;  %319 = vst [vmem:[%s1044_s16] sm:$0x1] %v880_v29  ;;  %s801_s22 = sshll.u32 %s1109_s18, 2 }
  0x13   : > { %v346_v14 = vrot.slane %v339_v6, %v942_v9  ;;  %v377_v22 = vmax.f32 %v320_v12, %v376_v20  ;;  %v386_v23 = vmax.f32 %v321_v13, %v385_v21  ;;  %s306_s25 = scalar_lea.vmem %s1099_s3, %s801_s22 }
  0x15   : > { %v353_v19 = vrot.slane %v346_v14, %v942_v9  ;;  %v378_v27 = vmax.f32 %v377_v22, %v322_v17  ;;  %v387_v28 = vmax.f32 %v386_v23, %v323_v18 }
  0x17   : > { %vm354_vm2 = vcmp.ne.s32.totalorder %v353_v19, 0  ;;  %v379_v31 = vrot.slane %v378_v27, 4  ;;  %v388_v32 = vrot.slane %v387_v28, 4 }
  0x18   : > { %vm954_vm3 = vmand %vm336_vm1, %vm354_vm2 }
  0x19   : > { %v797_v30 = vsel %vm954_vm3, 1.0, %v880_v29  ;;  %v380_v35 = vmax.f32 %v378_v27, %v379_v31  ;;  %v389_v36 = vmax.f32 %v387_v28, %v388_v32  ;;  %v356_v60 = vsel %vm954_vm3, %v326_v11, 0 }
  0x1a   : > { %v584_v33 = vrot.slane %v797_v30, %v959_v25  ;;  %v588_v34 = vrot.slane %v797_v30, %v962_v26  ;;  %v974_v61 = vrot.slane %v356_v60, %v959_v25  ;;  %v977_v62 = vrot.slane %v356_v60, %v962_v26 }
  0x1b   : > { %v381_v40 = vrot.slane %v380_v35, 2  ;;  %v390_v41 = vrot.slane %v389_v36, 2 }
  0x1c   : > { %v591_v37 = vsel %vm560_vm4, %v584_v33, 0.0  ;;  %v592_v38 = vsel %vm560_vm4, %v588_v34, 0.0  ;;  %vm369_vm5 = vcmp.eq.s32.totalorder %v934_v4, %v974_v61  ;;  %vm370_vm6 = vcmp.eq.s32.totalorder %v934_v4, %v977_v62 }
  0x1d   : > { %v593_v39 = vadd.f32 %v592_v38, %v591_v37  ;;  %v382_v42 = vmax.f32 %v380_v35, %v381_v40  ;;  %v391_v43 = vmax.f32 %v389_v36, %v390_v41  ;;  %vm371_vm7 = vcmp.eq.s32.totalorder %v980_v63, %v974_v61 }
  0x1e   : > { %vm372_vm8 = vcmp.eq.s32.totalorder %v980_v63, %v977_v62  ;;  %vm373_vm9 = vcmp.eq.s32.totalorder %v983_v0, %v974_v61  ;;  %vm374_vm10 = vcmp.eq.s32.totalorder %v983_v0, %v977_v62 }
  0x1f   : > { %594 = vadd.xlane.f32.xlu0 %v593_v39  ;;  %v383_v44 = vrot.slane %v382_v42, 1  ;;  %v392_v45 = vrot.slane %v391_v43, 1 }
  0x21   : > { %v384_v46 = vmax.f32 %v382_v42, %v383_v44  ;;  %v393_v47 = vmax.f32 %v391_v43, %v392_v45 }
  0x23   : > { %v394_v48 = vsub.f32 %v320_v12, %v384_v46  ;;  %v395_v49 = vsub.f32 %v321_v13, %v393_v47  ;;  %v396_v50 = vsub.f32 %v322_v17, %v384_v46  ;;  %v397_v51 = vsub.f32 %v323_v18, %v393_v47 }
  0x24   : > { %v398_v52 = vsub.f32 %v324_v15, %v384_v46  ;;  %v399_v53 = vsub.f32 %v325_v16, %v393_v47 }
  0x25   : > { %v400_v54 = vmul.f32 1.442695, %v394_v48  ;;  %v402_v55 = vmul.f32 1.442695, %v395_v49  ;;  %v404_v56 = vmul.f32 1.442695, %v396_v50 }
  0x26   : > { %v406_v57 = vmul.f32 1.442695, %v397_v51  ;;  %v408_v58 = vmul.f32 1.442695, %v398_v52  ;;  %v410_v59 = vmul.f32 1.442695, %v399_v53 }
  0x27   : > { %837 = vpow2.f32 %v400_v54 }
  0x28   : > { %839 = vpow2.f32 %v402_v55 }
  0x29   : > { %841 = vpow2.f32 %v404_v56 }
  0x2a   : > { %843 = vpow2.f32 %v406_v57 }
  0x2b   : > { %845 = vpow2.f32 %v408_v58 }
  0x2c   : > { %847 = vpow2.f32 %v410_v59 }
  0x34   : > { %v838_v1 = vpop.eup %837 }
  0x35   : > { %v840_v2 = vpop.eup %839  ;;  %v430_v3 = vsel %vm369_vm5, %v838_v1, 0.0 }
  0x36   : > { %v842_v5 = vpop.eup %841  ;;  %v431_v6 = vsel %vm370_vm6, %v840_v2, 0.0 }
  0x37   : > { %v844_v7 = vpop.eup %843  ;;  %v432_v8 = vsel %vm371_vm7, %v842_v5, 0.0  ;;  %v412_v10 = vadd.f32 %v842_v5, %v838_v1 }
  0x38   : > { %v846_v11 = vpop.eup %845  ;;  %v433_v12 = vsel %vm372_vm8, %v844_v7, 0.0  ;;  %v436_v13 = vadd.f32 %v432_v8, %v430_v3  ;;  %v421_v14 = vadd.f32 %v844_v7, %v840_v2 }
  0x39   : > { %v848_v15 = vpop.eup %847  ;;  %v434_v16 = vsel %vm373_vm9, %v846_v11, 0.0  ;;  %v445_v17 = vadd.f32 %v433_v12, %v431_v6  ;;  %v413_v18 = vsel %vm375_vm0, %v846_v11, 0.0  ;;  %v456_v11 = vld [vmem:[%s1098_s2 + $0x10] sm:$0x7] }
  0x3a   : > { %v435_v19 = vsel %vm374_vm10, %v848_v15, 0.0  ;;  %v437_v20 = vsel %vm375_vm0, %v434_v16, 0.0  ;;  %v414_v21 = vadd.f32 %v413_v18, %v412_v10  ;;  %v422_v22 = vsel %vm375_vm0, %v848_v15, 0.0 }
  0x3b   : > { %v438_v23 = vadd.f32 %v437_v20, %v436_v13  ;;  %v446_v27 = vsel %vm375_vm0, %v435_v19, 0.0  ;;  %v423_v28 = vadd.f32 %v422_v22, %v421_v14  ;;  %v579_v19 = vld [vmem:[%s310_s13] sm:$0x1] }
  0x3c   : > { %v447_v30 = vadd.f32 %v446_v27, %v445_v17  ;;  %v415_v31 = vrot.slane %v414_v21, 4 }
  0x3d   : > { %v424_v32 = vrot.slane %v423_v28, 4  ;;  %v439_v33 = vrot.slane %v438_v23, 4 }
  0x3e   : > { %v416_v34 = vadd.f32 %v415_v31, %v414_v21  ;;  %v448_v35 = vrot.slane %v447_v30, 4 }
  0x3f   : > { %v425_v36 = vadd.f32 %v424_v32, %v423_v28  ;;  %v440_v40 = vadd.f32 %v439_v33, %v438_v23 }
  0x40   : > { %v417_v37 = vrot.slane %v416_v34, 2  ;;  %v449_v42 = vadd.f32 %v448_v35, %v447_v30 }
  0x41   : > { %v426_v38 = vrot.slane %v425_v36, 2  ;;  %v441_v46 = vrot.slane %v440_v40, 2 }
  0x42   : > { %v418_v39 = vadd.f32 %v417_v37, %v416_v34  ;;  %v450_v48 = vrot.slane %v449_v42, 2 }
  0x43   : > { %v427_v41 = vadd.f32 %v426_v38, %v425_v36  ;;  %v442_v49 = vadd.f32 %v441_v46, %v440_v40 }
  0x44   : > { %v419_v43 = vrot.slane %v418_v39, 1  ;;  %v451_v50 = vadd.f32 %v450_v48, %v449_v42 }
  0x45   : > { %v428_v44 = vrot.slane %v427_v41, 1  ;;  %v443_v51 = vrot.slane %v442_v49, 1 }
  0x46   : > { %v420_v45 = vadd.f32 %v419_v43, %v418_v39  ;;  %v452_v52 = vrot.slane %v451_v50, 1 }
  0x47   : > { %v429_v47 = vadd.f32 %v428_v44, %v427_v41  ;;  %v444_v53 = vadd.f32 %v443_v51, %v442_v49 }
  0x48   : > { %849 = vrcp.f32 %v420_v45  ;;  %v453_v54 = vadd.f32 %v452_v52, %v451_v50 }
  0x49   : > { %851 = vrcp.f32 %v429_v47 }
  0x55   : > { %v850_v55 = vpop.eup %849 }
  0x56   : > { %v852_v56 = vpop.eup %851  ;;  %v497_v57 = vmul.f32 %v850_v55, %v444_v53 }
  0x57   : > { %v499_v58 = vmul.f32 %v852_v56, %v453_v54 }
  0x59   : > { %v502_v59 = vcombine.low %v497_v57, %v499_v58 }
  0x5b   : > { %v509_v60 = vrot.slane %v502_v59, %v942_v9 }
  0x5d   : > { %v516_v1 = vrot.slane %v509_v60, %v942_v9 }
  0x5f   : > { %v1023_v2 = vsel %vm954_vm3, %v516_v1, 1.0 }
  0x60   : > { %vm577_vm11 = vcmp.le.f32.partialorder %v1023_v2, 0.7  ;;  %v542_v57 = vrot.slane %v1023_v2, %v959_v25  ;;  %v546_v58 = vrot.slane %v1023_v2, %v962_v26 }
  0x61   : > { %vm578_vm12 = vmand %vm954_vm3, %vm577_vm11 }
  0x62   : > { %v798_v3 = vsel %vm578_vm12, 1.0, %v880_v29 }
  0x63   : > { %v613_v5 = vrot.slane %v798_v3, %v959_v25  ;;  %v617_v6 = vrot.slane %v798_v3, %v962_v26 }
  0x65   : > { %v620_v7 = vsel %vm560_vm4, %v613_v5, 0.0  ;;  %v621_v8 = vsel %vm560_vm4, %v617_v6, 0.0  ;;  %v606_v6 = vld [vmem:[%s1044_s16] sm:$0x1] }
  0x66   : > { %v622_v10 = vadd.f32 %v621_v8, %v620_v7 }
  0x68   : > { %623 = vadd.xlane.f32.xlu0 %v622_v10 }
  0x7e   : > { %469 = vperm.xlu0 %836, %v456_v11  }
  0x89   : > { %v460_v22 = vpop.permute.xlu1 %459 }
  0x8a   : > { %v472_v29 = vsel %vm369_vm5, %v460_v22, 0.0  ;;  %v473_v31 = vsel %vm370_vm6, %v460_v22, 0.0 }
  0x8d   : > { %v465_v28 = vpop.permute.xlu1 %464 }
  0x8e   : > { %v474_v32 = vsel %vm371_vm7, %v465_v28, 0.0  ;;  %v475_v33 = vsel %vm372_vm8, %v465_v28, 0.0 }
  0x8f   : > { %v478_v36 = vadd.f32 %v474_v32, %v472_v29  ;;  %v487_v37 = vadd.f32 %v475_v33, %v473_v31 }
  0xa8   : > { %v595_v12 = vpop.xlane.xlu0 %594 }
  0xa9   : > { %v596_v13 = vrot.slane %v595_v12, 4 }
  0xab   : > { %v597_v14 = vadd.f32 %v596_v13, %v595_v12 }
  0xad   : > { %v598_v15 = vrot.slane %v597_v14, 2 }
  0xaf   : > { %v599_v16 = vadd.f32 %v598_v15, %v597_v14 }
  0xb1   : > { %v600_v17 = vrot.slane %v599_v16, 1 }
  0xb3   : > { %v601_v18 = vadd.f32 %v600_v17, %v599_v16 }
  0xb5   : > { %803 = vpush %v601_v18 }
  0xe6   : > { %s804_s17 = spop %803 }
  0xe7   : > { %v603_v20 = vstv %s804_s17 }
  0xe8   : > { %v604_v21 = vadd.f32 %v603_v20, %v579_v19 }
  0xea   : > { %605 = vst [vmem:[%s310_s13] sm:$0x1] %v604_v21 }
  0xf1   : > { %v624_v23 = vpop.xlane.xlu0 %623 }
  0xf2   : > { %v625_v27 = vrot.slane %v624_v23, 4 }
  0xf4   : > { %v626_v30 = vadd.f32 %v625_v27, %v624_v23 }
  0xf6   : > { %v627_v34 = vrot.slane %v626_v30, 2 }
  0xf8   : > { %v628_v35 = vadd.f32 %v627_v34, %v626_v30 }
  0xf9   : > { %v470_v38 = vpop.permute.xlu0 %469 }
  0xfa   : > { %v629_v39 = vrot.slane %v628_v35, 1  ;;  %v476_v40 = vsel %vm373_vm9, %v470_v38, 0.0  ;;  %v477_v4 = vsel %vm374_vm10, %v470_v38, 0.0 }
  0xfb   : > { %v479_v41 = vsel %vm375_vm0, %v476_v40, 0.0  ;;  %v488_v42 = vsel %vm375_vm0, %v477_v4, 0.0 }
  0xfc   : > { %v630_v63 = vadd.f32 %v629_v39, %v628_v35  ;;  %v480_v43 = vadd.f32 %v479_v41, %v478_v36  ;;  %v489_v44 = vadd.f32 %v488_v42, %v487_v37 }
  0xfe   : > { %805 = vpush %v630_v63  ;;  %v481_v45 = vrot.slane %v480_v43, 4  ;;  %v490_v46 = vrot.slane %v489_v44, 4 }
 0x100   : > { %v482_v47 = vadd.f32 %v481_v45, %v480_v43  ;;  %v491_v48 = vadd.f32 %v490_v46, %v489_v44 }
 0x102   : > { %v483_v49 = vrot.slane %v482_v47, 2  ;;  %v492_v61 = vrot.slane %v491_v48, 2 }
 0x104   : > { %v484_v50 = vadd.f32 %v483_v49, %v482_v47  ;;  %v493_v51 = vadd.f32 %v492_v61, %v491_v48 }
 0x106   : > { %v485_v52 = vrot.slane %v484_v50, 1  ;;  %v494_v62 = vrot.slane %v493_v51, 1 }
 0x108   : > { %v486_v0 = vadd.f32 %v485_v52, %v484_v50  ;;  %v495_v53 = vadd.f32 %v494_v62, %v493_v51 }
 0x10a   : > { %v521_v54 = vcombine.low %v486_v0, %v495_v53 }
 0x10c   : > { %v528_v55 = vrot.slane %v521_v54, %v942_v9 }
 0x10e   : > { %v535_v56 = vrot.slane %v528_v55, %v942_v9 }
 0x110   : > { %v537_v59 = vsel %vm954_vm3, %v535_v56, 0.0 }
 0x111   : > { %v553_v60 = vrot.slane %v537_v59, %v959_v25  ;;  %v557_v1 = vrot.slane %v537_v59, %v962_v26 }
 0x113   : > { %v561_v9 = vsel %vm560_vm4, %v542_v57, %v553_v60  ;;  %v562_v3 = vsel %vm560_vm4, %v546_v58, %v557_v1 }
 0x114   : > { %v565_v5 = vcombine.low %v561_v9, %v562_v3 }
 0x116   : > { %796 = vst.sshfl [vmem:[%s306_s25] sm:$0x33 pattern:$0x76325410] %v565_v5 }
 0x12f   : > { %s806_s26 = spop %805 }
 0x130   : > { %v632_v2 = vstv %s806_s26 }
 0x131   : > { %v633_v7 = vadd.f32 %v632_v2, %v606_v6 }
 0x133   : > { %634 = vst [vmem:[%s1044_s16] sm:$0x1] %v633_v7 }
 0x134 PF: > { %s16_s20 = sadd.s32 1, %s875_s20   ;;  %s1104_s18 = smov %s871_s19 }
 0x135   : > { %p13_p5 = scmp.ge.s32.totalorder %s16_s20, 4   ;;  %s1105_s19 = smov %s1107_s21 }
 0x137   :  { %15 = sbr.rel (!%p13_p5) target bundleno = 2 (0x2), region = 93 }

// kernel: ohem_cross_entropy_2d.3
= control target key start
LH: loop header
LB: loop body
LE: loop exit
PB: predicated region body
PF: predicated region fallthrough
CT: control target
= control target key end

     0   :  { %s423_s14 = smov 0   ;;  %s425_s15 = smov 0   ;;  %s459_s0 = inlined_call_operand.<no memory space> [shape: f32[1], index: 0, kind: input, shape index: {}]   ;;  %s460_s1 = inlined_call_operand.vmem [shape: f32[2,2,2,128], index: 1, kind: input, shape index: {}]   ;;  %s461_s2 = inlined_call_operand.vmem [shape: f32[2,1,128], index: 2, kind: output, shape index: {0}]   ;;  %s462_s3 = inlined_call_operand.vmem [shape: f32[2,1,128], index: 3, kind: output, shape index: {1}]  }
   0x1   :  { %9 = sst [smem:[#allocation2]] %s459_s0  ;;  %s427_s16 = smov 0  }
   0x2 LB: > { %s27_s0 = sadd.s32 1, %s393_s15  ;;  %p337_p0 = scmp.ge.s32.totalorder %s397_s16, 1  ;;  %s397_s16 = sphi %s427_s16, %s15_s16   ;;  %s393_s15 = sphi %s425_s15, %s464_s15   ;;  %s389_s14 = sphi %s423_s14, %s463_s14  }
   0x3   : > { %p29_p1 = scmp.ge.s32.totalorder %s27_s0, 2  ;;  %p158_p2 = scmp.lt.s32.totalorder %s397_s16, 3 }
   0x5   : > { %s466_s0 = smov (%p29_p1, %s27_s0), 0  ;;  %p159_p3 = pnand %p337_p0, %p158_p2 }
   0x6   : > { %p186_p4 = scmp.lt.s32.totalorder (!%p159_p3), %s389_s14, 1  ;;  %s206_s21 = sld [smem:[#allocation2]] (!%p159_p3) }
   0x7   : > { %162 = sbr.rel (%p159_p3) target bundleno = 247 (0xf7), region = 28 }
   0xc   : > { %s468_s14 = smov (!%p186_p4, %s389_s14), 1  ;;  %v210_v2 = vstv %s206_s21  ;;  %vm219_vm1 = vcmask 1041408   ;;  %v399_v11 = vmov 0.0  }
   0xd   : > { %s343_s17 = sshll.u32 %s468_s14, 2  ;;  %s196_s24 = scalar_lea.vmem %s461_s2, %s468_s14 }
   0xe   : > { %s193_s20 = scalar_lea.vmem %s460_s1, %s343_s17  ;;  %204 = vst [vmem:[%s196_s24] sm:$0x1] %v399_v11  ;;  %s199_s27 = scalar_lea.vmem %s462_s3, %s468_s14 }
   0xf   : > { %v207_v0 = vld [vmem:[%s193_s20] sm:$0x3]  ;;  %v340_v3 = vld [vmem:[%s193_s20 + $0x2] sm:$0x3]  ;;  %205 = vst [vmem:[%s199_s27] sm:$0x1] %v399_v11 }
  0x10   : > { %v213_v1 = vmax.f32 %v207_v0, 1e-38  ;;  %vm211_vm0 = vcmp.le.f32.partialorder %v207_v0, %v210_v2 }
  0x11   : > { %v212_v6 = vsel %vm211_vm0, %v340_v3, 0.0 }
  0x12   : > { %373 = vlog2.f32 %v213_v1  ;;  %v234_v10 = vsel %vm219_vm1, %v212_v6, 0.0 }
  0x15   : > { %v217_v26 = vld [vmem:[%s196_s24] sm:$0x1] }
  0x16   : > { %v233_v29 = vld [vmem:[%s199_s27] sm:$0x1] }
  0x1f   : > { %v374_v4 = vpop.eup %373 }
  0x20   : > { %v215_v5 = vmul.f32 0.6931472, %v374_v4 }
  0x22   : > { %v216_v7 = vsub.f32 0.0, %v215_v5 }
  0x24   : > { %v218_v8 = vmul.f32 %v216_v7, %v212_v6 }
  0x26   : > { %v220_v9 = vsel %vm219_vm1, %v218_v8, 0.0 }
  0x27   : > { %221 = vadd.xlane.f32.xlu0 %v220_v9 }
  0x2b   : > { %235 = vadd.xlane.f32.xlu0 %v234_v10 }
  0xb0   : > { %v222_v12 = vpop.xlane.xlu0 %221 }
  0xb1   : > { %v223_v13 = vrot.slane %v222_v12, 4 }
  0xb3   : > { %v224_v14 = vadd.f32 %v223_v13, %v222_v12 }
  0xb4   : > { %v236_v15 = vpop.xlane.xlu0 %235 }
  0xb5   : > { %v225_v16 = vrot.slane %v224_v14, 2  ;;  %v237_v17 = vrot.slane %v236_v15, 4 }
  0xb7   : > { %v238_v18 = vadd.f32 %v237_v17, %v236_v15  ;;  %v226_v19 = vadd.f32 %v225_v16, %v224_v14 }
  0xb9   : > { %v239_v20 = vrot.slane %v238_v18, 2  ;;  %v227_v21 = vrot.slane %v226_v19, 1 }
  0xbb   : > { %v240_v22 = vadd.f32 %v239_v20, %v238_v18  ;;  %v228_v23 = vadd.f32 %v227_v21, %v226_v19 }
  0xbd   : > { %344 = vpush %v228_v23  ;;  %v241_v24 = vrot.slane %v240_v22, 1 }
  0xbf   : > { %v242_v25 = vadd.f32 %v241_v24, %v240_v22 }
  0xc1   : > { %346 = vpush %v242_v25 }
  0xee   : > { %s345_s28 = spop %344 }
  0xef   : > { %v230_v27 = vstv %s345_s28 }
  0xf0   : > { %v231_v28 = vadd.f32 %v230_v27, %v217_v26 }
  0xf2   : > { %232 = vst [vmem:[%s196_s24] sm:$0x1] %v231_v28  ;;  %s347_s29 = spop %346 }
  0xf3   : > { %v244_v30 = vstv %s347_s29 }
  0xf4   : > { %v245_v31 = vadd.f32 %v244_v30, %v233_v29 }
  0xf6   : > { %246 = vst [vmem:[%s199_s27] sm:$0x1] %v245_v31 }
  0xf7 PF: > { %s15_s16 = sadd.s32 1, %s397_s16   ;;  %s463_s14 = smov %s393_s15 }
  0xf8   : > { %p12_p5 = scmp.ge.s32.totalorder %s15_s16, 4   ;;  %s464_s15 = smov %s466_s0 }
  0xfa   :  { %14 = sbr.rel (!%p12_p5) target bundleno = 2 (0x2), region = 75 }

</bundles_post_ra>
